<compile_context>
chip_gen: v7x
topology: tpu7x:2x2x1
jax: 0.10.0
libtpu: 0.0.40
codegen_flags: <defaults>
</compile_context>

<pallas_src>
import functools

import jax
import jax.numpy as jnp
from jax.experimental import pallas as pl
from jax.experimental.pallas import tpu as pltpu


def _round_up(x, m):
    return ((x + m - 1) // m) * m


# ---------------------------------------------------------------------------
# Pallas kernels
# ---------------------------------------------------------------------------
def _gemm_bias_act_kernel(a_ref, b_ref, bias_ref, o_ref, acc_ref, *, apply_relu):
    """One (tm, tn) output tile of  o = act(a @ b + bias),  reduced over the k grid axis.

    a:(tm,tk) bf16, b:(tk,tn) bf16, bias:(tm,1) f32, acc scratch (tm,tn) f32.
    """
    @pl.when(pl.program_id(2) == 0)
    def _():
        acc_ref[...] = jnp.zeros_like(acc_ref)

    acc_ref[...] += jnp.dot(a_ref[...], b_ref[...], preferred_element_type=jnp.float32)

    @pl.when(pl.program_id(2) == pl.num_programs(2) - 1)
    def _():
        y = acc_ref[...] + bias_ref[...]          # f32 epilogue (v5e VPU has no bf16 ALU)
        if apply_relu:
            y = jnp.maximum(y, 0.0)
        o_ref[...] = y.astype(o_ref.dtype)


def _window_max_kernel(x_ref, o_ref):
    """x:(KK, tl) -> o:(1, tl) = max over the KK pooling-window positions (lane-dense)."""
    o_ref[...] = jnp.max(x_ref[...], axis=0, keepdims=True)


# ---------------------------------------------------------------------------
# Pallas-backed layer wrappers
# ---------------------------------------------------------------------------
def gemm_bias_act(a, b, bias, apply_relu, out_dtype=jnp.float32):
    """out = act(a @ b + bias[:, None]).   a:(M,K)  b:(K,N)  bias:(M,)  ->  (M,N).

    Tiled / pipelined / megacore-parallel Pallas GEMM. Operands are cast to bf16 for the
    MXU; accumulation and the bias+ReLU epilogue stay in f32.
    """
    M, K = a.shape
    K2, N = b.shape
    assert K == K2 and bias.shape == (M,)

    # Modest tiles: 2 x double-buffered bf16 inputs + f32 acc stay far under 32 MiB scoped
    # VMEM (safe even on v7x's 64 MiB physical VMEM).
    tm = min(256, _round_up(M, 8))
    tn = min(512, _round_up(N, 128))
    tk = min(512, _round_up(K, 128))
    Mp, Np, Kp = _round_up(M, tm), _round_up(N, tn), _round_up(K, tk)

    a_p = jnp.pad(a.astype(jnp.bfloat16), ((0, Mp - M), (0, Kp - K)))
    b_p = jnp.pad(b.astype(jnp.bfloat16), ((0, Kp - K), (0, Np - N)))
    bias_p = jnp.pad(bias.astype(jnp.float32), (0, Mp - M)).reshape(Mp, 1)

    kernel = functools.partial(_gemm_bias_act_kernel, apply_relu=apply_relu)
    out = pl.pallas_call(
        kernel,
        out_shape=jax.ShapeDtypeStruct((Mp, Np), out_dtype),
        grid_spec=pltpu.PrefetchScalarGridSpec(
            num_scalar_prefetch=0,
            grid=(Mp // tm, Np // tn, Kp // tk),
            in_specs=[
                pl.BlockSpec((tm, tk), lambda i, j, k: (i, k)),
                pl.BlockSpec((tk, tn), lambda i, j, k: (k, j)),
                pl.BlockSpec((tm, 1), lambda i, j, k: (i, 0)),
            ],
            out_specs=pl.BlockSpec((tm, tn), lambda i, j, k: (i, j)),
            scratch_shapes=[pltpu.VMEM((tm, tn), jnp.float32)],
        ),
        compiler_params=pltpu.CompilerParams(
            dimension_semantics=("parallel", "parallel", "arbitrary"),
            vmem_limit_bytes=32 * 1024 * 1024,
        ),
    )(a_p, b_p, bias_p)
    return out[:M, :N]


def conv2d_relu(x_cnhw, w_oihw, b, apply_relu=True):
    """VALID conv, stride 1 (torch defaults here).  x:(Cin,N,H,W) -> (Cout,N,Hout,Wout).

    Lowered to im2col (XLA glue) + the tiled Pallas GEMM.  The "transposed" formulation
    (Cout rows, N*Hout*Wout lanes) keeps the GEMM output lane-dense even for tiny Cout.
    """
    Cout, Cin, KH, KW = w_oihw.shape
    Cin2, N, H, W = x_cnhw.shape
    assert Cin == Cin2
    Hout, Wout = H - KH + 1, W - KW + 1
    # TODO(synk): replace HBM-materialized im2col with an in-kernel halo-DMA conv.
    taps = [x_cnhw[:, :, kh:kh + Hout, kw:kw + Wout]
            for kh in range(KH) for kw in range(KW)]
    patches = jnp.concatenate(taps, axis=0).reshape(KH * KW * Cin, N * Hout * Wout)
    # (Cout, Cin, KH, KW) -> rows ordered (kh, kw, cin) to match patch row order.
    w_mat = jnp.transpose(w_oihw, (0, 2, 3, 1)).reshape(Cout, KH * KW * Cin)
    y = gemm_bias_act(w_mat, patches, b, apply_relu)          # (Cout, N*Hout*Wout)
    return y.reshape(Cout, N, Hout, Wout)


def maxpool2d(x_cnhw, pk):
    """MaxPool2d(kernel=stride=pk) on (C,N,H,W); windows gathered to a lane-dense slab."""
    C, N, H, W = x_cnhw.shape
    Hp, Wp = (H - pk) // pk + 1, (W - pk) // pk + 1
    x = x_cnhw[:, :, :Hp * pk, :Wp * pk]
    x = x.reshape(C, N, Hp, pk, Wp, pk)
    x = jnp.transpose(x, (3, 5, 0, 1, 2, 4)).reshape(pk * pk, C * N * Hp * Wp)

    L = C * N * Hp * Wp
    tl = min(2048, _round_up(L, 128))
    Lp = _round_up(L, tl)
    x = jnp.pad(x, ((0, 0), (0, Lp - L)))

    out = pl.pallas_call(
        _window_max_kernel,
        out_shape=jax.ShapeDtypeStruct((1, Lp), x_cnhw.dtype),
        grid_spec=pltpu.PrefetchScalarGridSpec(
            num_scalar_prefetch=0,
            grid=(Lp // tl,),
            in_specs=[pl.BlockSpec((pk * pk, tl), lambda i: (0, i))],
            out_specs=pl.BlockSpec((1, tl), lambda i: (0, i)),
        ),
        compiler_params=pltpu.CompilerParams(
            dimension_semantics=("parallel",),
            vmem_limit_bytes=32 * 1024 * 1024,
        ),
    )(x)
    return out[0, :L].reshape(C, N, Hp, Wp)


# ---------------------------------------------------------------------------
# ConvClassifier: parameter init + forward
# ---------------------------------------------------------------------------
def init_conv_classifier(key, in_size, out_classes, channels, pool_every, hidden_dims,
                         kernel_size=3, pool_kernel=2):
    C, H, W = in_size
    keys = iter(jax.random.split(key, 2 * (len(channels) + len(hidden_dims) + 1)))
    conv_ps = []
    in_ch, hh, ww = C, H, W
    for i, out_ch in enumerate(channels):
        hh, ww = hh - kernel_size + 1, ww - kernel_size + 1
        wt = 0.1 * jax.random.normal(next(keys), (out_ch, in_ch, kernel_size, kernel_size),
                                     jnp.float32)
        bs = 0.1 * jax.random.normal(next(keys), (out_ch,), jnp.float32)
        conv_ps.append((wt, bs))
        if (i + 1) % pool_every == 0:
            hh = (hh - pool_kernel) // pool_kernel + 1
            ww = (ww - pool_kernel) // pool_kernel + 1
        in_ch = out_ch
    fc_ps = []
    num_feat = channels[-1] * hh * ww
    for dim in hidden_dims:
        fc_ps.append((0.05 * jax.random.normal(next(keys), (dim, num_feat), jnp.float32),
                      0.05 * jax.random.normal(next(keys), (dim,), jnp.float32)))
        num_feat = dim
    fc_ps.append((0.05 * jax.random.normal(next(keys), (out_classes, num_feat), jnp.float32),
                  0.05 * jax.random.normal(next(keys), (out_classes,), jnp.float32)))
    return {"conv": conv_ps, "fc": fc_ps}


def conv_classifier_forward(params, x_nchw, pool_every, pool_kernel=2):
    # Channels-first / batch-second layout keeps the big batch*spatial dimension on the
    # lane axis of every Pallas GEMM output.
    x = jnp.transpose(x_nchw, (1, 0, 2, 3))                   # NCHW -> (C, N, H, W)
    for i, (w, b) in enumerate(params["conv"]):
        x = conv2d_relu(x, w, b, apply_relu=True)
        if (i + 1) % pool_every == 0:
            x = maxpool2d(x, pool_kernel)
    C, N, H, W = x.shape
    # Flatten to (C*H*W, N) with rows in torch's (c, h, w) order, so the PyTorch-layout
    # FC weights (out, in) are used directly as the GEMM LHS (no runtime weight transpose).
    feats_t = jnp.transpose(x, (0, 2, 3, 1)).reshape(C * H * W, N)
    n_fc = len(params["fc"])
    for j, (w, b) in enumerate(params["fc"]):
        feats_t = gemm_bias_act(w, feats_t, b, apply_relu=(j < n_fc - 1))
    return jnp.transpose(feats_t)                              # (N, out_classes)


# ---------------------------------------------------------------------------
# Pure-JAX f32 reference (for correctness check only)
# ---------------------------------------------------------------------------
def reference_forward(params, x_nchw, pool_every, pool_kernel=2):
    x = x_nchw
    for i, (w, b) in enumerate(params["conv"]):
        x = jax.lax.conv_general_dilated(
            x, w, (1, 1), "VALID", dimension_numbers=("NCHW", "OIHW", "NCHW"))
        x = jnp.maximum(x + b[None, :, None, None], 0.0)
        if (i + 1) % pool_every == 0:
            x = jax.lax.reduce_window(
                x, -jnp.inf, jax.lax.max,
                (1, 1, pool_kernel, pool_kernel), (1, 1, pool_kernel, pool_kernel), "VALID")
    feats = x.reshape(x.shape[0], -1)
    n_fc = len(params["fc"])
    for j, (w, b) in enumerate(params["fc"]):
        feats = feats @ w.T + b
        if j < n_fc - 1:
            feats = jnp.maximum(feats, 0.0)
    return feats


if __name__ == "__main__":
    key = jax.random.PRNGKey(0)
    pkey, xkey = jax.random.split(key)

    in_size = (4, 16, 16)      # (C, H, W)
    out_classes = 10
    channels = [8, 16]
    pool_every = 2
    hidden_dims = [32]
    batch = 2

    params = init_conv_classifier(pkey, in_size, out_classes, channels, pool_every, hidden_dims)
    x = jax.random.normal(xkey, (batch,) + in_size, jnp.float32)

    out = jax.block_until_ready(conv_classifier_forward(params, x, pool_every))
    ref = jax.block_until_ready(reference_forward(params, x, pool_every))

    assert out.shape == (batch, out_classes), out.shape
    # bf16 MXU operands (f32 accumulation) -> loosened tolerance vs the f32 reference.
    assert bool(jnp.allclose(out, ref, atol=3e-2, rtol=3e-2)), "Pallas output mismatch vs reference"
    print("KERNEL_OK")
</pallas_src>

<mosaic_0001>
module attributes {stable_mosaic.version = 11 : i64} {
  func.func @_gemm_bias_act_kernel(%arg0: i32, %arg1: i32, %arg2: i32, %arg3: memref<8x128xbf16, #tpu.memory_space<vmem>>, %arg4: memref<128x512xbf16, #tpu.memory_space<vmem>>, %arg5: memref<8x1xf32, #tpu.memory_space<vmem>>, %arg6: memref<8x512xf32, #tpu.memory_space<vmem>>, %arg7: memref<8x512xf32, #tpu.memory_space<vmem>>) attributes {dimension_semantics = [#tpu.dimension_semantics<parallel>, #tpu.dimension_semantics<parallel>, #tpu.dimension_semantics<arbitrary>], iteration_bounds = array<i64: 1, 1, 1>, scalar_prefetch = 0 : i64, scratch_operands = 1 : i64, tpu.core_type = #tpu.core_type<tc>, window_params = [{transform_indices = @transform_0, window_bounds = array<i64: 8, 128>}, {transform_indices = @transform_1, window_bounds = array<i64: 128, 512>}, {transform_indices = @transform_2, window_bounds = array<i64: 8, 1>}, {transform_indices = @transform_3, window_bounds = array<i64: 8, 512>}]} {
    %c0_i32 = arith.constant 0 : i32
    %0 = arith.cmpi eq, %arg2, %c0_i32 : i32
    %1 = arith.extui %0 : i1 to i32
    %c0_i32_0 = arith.constant 0 : i32
    %2 = arith.cmpi ne, %1, %c0_i32_0 : i32
    scf.if %2 {
      %cst_10 = arith.constant 0.000000e+00 : f32
      %12 = vector.broadcast %cst_10 : f32 to vector<8x512xf32>
      %c0_11 = arith.constant 0 : index
      %c0_12 = arith.constant 0 : index
      %13 = vector.load %arg7[%c0_11, %c0_12] : memref<8x512xf32, #tpu.memory_space<vmem>>, vector<8x512xf32>
      tpu.vector_store %arg7[%c0_11, %c0_12], %12 {strides = array<i32>} : memref<8x512xf32, #tpu.memory_space<vmem>>, vector<8x512xf32>,
    } else {
    }
    %c0 = arith.constant 0 : index
    %c0_1 = arith.constant 0 : index
    %3 = vector.load %arg7[%c0, %c0_1] : memref<8x512xf32, #tpu.memory_space<vmem>>, vector<8x512xf32>
    %c0_2 = arith.constant 0 : index
    %c0_3 = arith.constant 0 : index
    %4 = vector.load %arg3[%c0_2, %c0_3] : memref<8x128xbf16, #tpu.memory_space<vmem>>, vector<8x128xbf16>
    %c0_4 = arith.constant 0 : index
    %c0_5 = arith.constant 0 : index
    %5 = vector.load %arg4[%c0_4, %c0_5] : memref<128x512xbf16, #tpu.memory_space<vmem>>, vector<128x512xbf16>
    %cst = arith.constant dense<0.000000e+00> : vector<8x512xf32>
    %6 = tpu.matmul %4, %5, %cst {dimension_numbers = #tpu.dot_dimension_numbers<[1], [0], [0], [1], [0, 0, 1, 1], [], []>} : vector<8x128xbf16>, vector<128x512xbf16>, vector<8x512xf32> -> vector<8x512xf32>
    %7 = arith.addf %3, %6 : vector<8x512xf32>
    %c0_6 = arith.constant 0 : index
    %c0_7 = arith.constant 0 : index
    %8 = vector.load %arg7[%c0_6, %c0_7] : memref<8x512xf32, #tpu.memory_space<vmem>>, vector<8x512xf32>
    tpu.vector_store %arg7[%c0_6, %c0_7], %7 {strides = array<i32>} : memref<8x512xf32, #tpu.memory_space<vmem>>, vector<8x512xf32>,
    %c0_i32_8 = arith.constant 0 : i32
    %9 = arith.cmpi eq, %arg2, %c0_i32_8 : i32
    %10 = arith.extui %9 : i1 to i32
    %c0_i32_9 = arith.constant 0 : i32
    %11 = arith.cmpi ne, %10, %c0_i32_9 : i32
    scf.if %11 {
      %c0_10 = arith.constant 0 : index
      %c0_11 = arith.constant 0 : index
      %12 = vector.load %arg7[%c0_10, %c0_11] : memref<8x512xf32, #tpu.memory_space<vmem>>, vector<8x512xf32>
      %c0_12 = arith.constant 0 : index
      %c0_13 = arith.constant 0 : index
      %13 = vector.load %arg5[%c0_12, %c0_13] : memref<8x1xf32, #tpu.memory_space<vmem>>, vector<8x1xf32>
      %14 = vector.broadcast %13 : vector<8x1xf32> to vector<8x512xf32>
      %15 = arith.addf %12, %14 : vector<8x512xf32>
      %cst_14 = arith.constant 0.000000e+00 : f32
      %16 = vector.broadcast %cst_14 : f32 to vector<8x512xf32>
      %17 = arith.maximumf %15, %16 : vector<8x512xf32>
      %c0_15 = arith.constant 0 : index
      %c0_16 = arith.constant 0 : index
      %18 = vector.load %arg6[%c0_15, %c0_16] : memref<8x512xf32, #tpu.memory_space<vmem>>, vector<8x512xf32>
      tpu.vector_store %arg6[%c0_15, %c0_16], %17 {strides = array<i32>} : memref<8x512xf32, #tpu.memory_space<vmem>>, vector<8x512xf32>,
    } else {
    }
    return
  }
  func.func @transform_0(%arg0: i32, %arg1: i32, %arg2: i32) -> (i32, i32) {
    %c0_i32 = arith.constant 0 : i32
    return %arg0, %arg2 : i32, i32
  }
  func.func @transform_1(%arg0: i32, %arg1: i32, %arg2: i32) -> (i32, i32) {
    %c0_i32 = arith.constant 0 : i32
    return %arg2, %arg1 : i32, i32
  }
  func.func @transform_2(%arg0: i32, %arg1: i32, %arg2: i32) -> (i32, i32) {
    %c0_i32 = arith.constant 0 : i32
    %c0_i32_0 = arith.constant 0 : i32
    return %arg0, %c0_i32 : i32, i32
  }
  func.func @transform_3(%arg0: i32, %arg1: i32, %arg2: i32) -> (i32, i32) {
    %c0_i32 = arith.constant 0 : i32
    return %arg0, %arg1 : i32, i32
  }
}

</mosaic_0001>

<bundles_post_ra>
// kernel: tpu_custom_call.1
= control target key start
LH: loop header
LB: loop body
LE: loop exit
PB: predicated region body
PF: predicated region fallthrough
CT: control target
= control target key end

     0   :  { %8 = vsyncpa [#allocation4], 0  ;;  %s554_s0 = inlined_call_operand.vmem [shape: bf16[8,128], index: 0, kind: input, shape index: {}]   ;;  %s555_s1 = inlined_call_operand.hbm [shape: bf16[128,512], index: 1, kind: input, shape index: {}]   ;;  %s556_s2 = inlined_call_operand.vmem [shape: f32[8,1], index: 2, kind: input, shape index: {}]   ;;  %s557_s3 = inlined_call_operand.hbm [shape: f32[8,512], index: 3, kind: output, shape index: {}]  }
   0x1   :  { %9 = vsyncpa [#allocation5], 0  ;;  %s499_s12 = smov [#allocation3]   ;;  %s451_s16 = scalar_lea.hbm %s555_s1, 4096 }
   0x2   :  { %s17_s13 = sshll.u32 %s499_s12, 4  ;;  %p452_p0 = scmp.ne.s32.totalorder %s555_s1, %s451_s16  ;;  %s18_s13 = int_to_ptr.vmem [resolvable:$true] %s17_s13 }
   0x3   :  { %p455_p1 = scmp.lt.u32.totalorder %s451_s16, %s555_s1 }
   0x5   :  { %p457_p2 = pnand %p455_p1, %p452_p0 }
   0x7   :  { %460 = shalt.err (!%p457_p2)
}
   0x8   :  { %s461_s21 = scalar_lea.vmem %s18_s13, 4096  ;;  %p466_p4 = scmp.lt.s32.totalorder %s18_s13, %s18_s13 }
   0x9   :  { %p462_p3 = scmp.ne.s32.totalorder %s18_s13, %s461_s21  ;;  %p467_p5 = scmp.lt.s32.totalorder %s461_s21, %s461_s21 }
   0xb   :  { %p468_p6 = por %p467_p5, %p466_p4 }
   0xd   :  { %p469_p7 = pnand %p468_p6, %p462_p3 }
   0xf   :  { %472 = shalt.err (!%p469_p7)
}
  0x10   :  { %s500_s22 = smov 256   ;;  %s501_s23 = smov 16  }
  0x11   :  { %23 = dma.hbm_to_vmem [thread:$0]  %s555_s1, 4096, %s18_s13, [#allocation4], %s500_s22, %s500_s22, %s501_s23  }
  0x12   :  { %495 = dma.done.wait [#allocation4], 4096  }
  0x13   :  { %496 = vsyncadd [#allocation4], 4294963200  ;;  %v502_v0 = vmov 0   ;;  %v403_v1 = vld [vmem:[#allocation3 + $0x4] ss:$16 sps:$4 sm:$0xff]  }
  0x14   :  { %267 = vmatprep.mubr.bf16.mxu0 %v502_v0  ;;  %308 = vmatprep.mubr.bf16.mxu1 %v502_v0  ;;  %v405_v2 = vld [vmem:[#allocation3 + $0xc] ss:$16 sps:$4 sm:$0xff]   ;;  %v407_v3 = vld [vmem:[#allocation3] ss:$16 sps:$4 sm:$0xff]   ;;  %v408_v4 = vld [vmem:[#allocation3 + $0x8] ss:$16 sps:$4 sm:$0xff]  }
  0x15   :  { %402 = vset.pattern.permute.xlu0 %v502_v0  ;;  %235 = vmatprep.subr.bf16.mxu0 %v403_v1  ;;  %v409_v5 = vld [vmem:[#allocation3 + $0x24] ss:$16 sps:$4 sm:$0xff]   ;;  %v411_v6 = vld [vmem:[#allocation3 + $0x2c] ss:$16 sps:$4 sm:$0xff]   ;;  %v413_v7 = vld [vmem:[#allocation3 + $0x20] ss:$16 sps:$4 sm:$0xff]  }
  0x16   :  { %276 = vmatprep.subr.bf16.mxu1 %v405_v2  ;;  %236 = vmatpush1.bf16.msra.mxu0 %v407_v3  ;;  %v414_v8 = vld [vmem:[#allocation3 + $0x28] ss:$16 sps:$4 sm:$0xff]   ;;  %v415_v9 = vld [vmem:[#allocation3 + $0x44] ss:$16 sps:$4 sm:$0xff]   ;;  %v417_v10 = vld [vmem:[#allocation3 + $0x4c] ss:$16 sps:$4 sm:$0xff]  }
  0x17   :  { %277 = vmatpush1.bf16.msra.mxu1 %v408_v4  ;;  %237 = vmatprep.subr.bf16.mxu0 %v409_v5  ;;  %v419_v11 = vld [vmem:[#allocation3 + $0x40] ss:$16 sps:$4 sm:$0xff]   ;;  %v420_v12 = vld [vmem:[#allocation3 + $0x48] ss:$16 sps:$4 sm:$0xff]   ;;  %v421_v13 = vld [vmem:[#allocation3 + $0x64] ss:$16 sps:$4 sm:$0xff]  }
  0x18   :  { %278 = vmatprep.subr.bf16.mxu1 %v411_v6  ;;  %v423_v14 = vld [vmem:[#allocation3 + $0x6c] ss:$16 sps:$4 sm:$0xff]   ;;  %v425_v15 = vld [vmem:[#allocation3 + $0x60] ss:$16 sps:$4 sm:$0xff]   ;;  %v426_v16 = vld [vmem:[#allocation3 + $0x68] ss:$16 sps:$4 sm:$0xff]  }
  0x19   :  { %v427_v17 = vld [vmem:[#allocation3 + $0x84] ss:$16 sps:$4 sm:$0xff]   ;;  %v429_v18 = vld [vmem:[#allocation3 + $0x8c] ss:$16 sps:$4 sm:$0xff]   ;;  %v431_v19 = vld [vmem:[#allocation3 + $0x80] ss:$16 sps:$4 sm:$0xff]  }
  0x1a   :  { %238 = vmatpush1.bf16.msra.mxu0 %v413_v7  ;;  %v432_v20 = vld [vmem:[#allocation3 + $0x88] ss:$16 sps:$4 sm:$0xff]   ;;  %v433_v21 = vld [vmem:[#allocation3 + $0xa4] ss:$16 sps:$4 sm:$0xff]   ;;  %v435_v22 = vld [vmem:[#allocation3 + $0xac] ss:$16 sps:$4 sm:$0xff]  }
  0x1b   :  { %279 = vmatpush1.bf16.msra.mxu1 %v414_v8  ;;  %239 = vmatprep.subr.bf16.mxu0 %v415_v9  ;;  %v437_v23 = vld [vmem:[#allocation3 + $0xa0] ss:$16 sps:$4 sm:$0xff]   ;;  %v438_v24 = vld [vmem:[#allocation3 + $0xa8] ss:$16 sps:$4 sm:$0xff]   ;;  %v439_v25 = vld [vmem:[#allocation3 + $0xc4] ss:$16 sps:$4 sm:$0xff]  }
  0x1c   :  { %280 = vmatprep.subr.bf16.mxu1 %v417_v10  ;;  %v441_v26 = vld [vmem:[#allocation3 + $0xcc] ss:$16 sps:$4 sm:$0xff]   ;;  %v332_v27 = vld [vmem:[%s556_s2] sm:$0xff]  ;;  %v444_v29 = vld [vmem:[#allocation3 + $0xc8] ss:$16 sps:$4 sm:$0xff]   ;;  %s503_s2 = smov [#allocation6]  }
  0x1d   :  { %335 = vperm.xlu0 %402, %v332_v27   ;;  %v443_v28 = vld [vmem:[#allocation3 + $0xc0] ss:$16 sps:$4 sm:$0xff]   ;;  %v445_v30 = vld [vmem:[#allocation3 + $0xe4] ss:$16 sps:$4 sm:$0xff]   ;;  %v447_v31 = vld [vmem:[#allocation3 + $0xec] ss:$16 sps:$4 sm:$0xff]  }
  0x1e   :  { %240 = vmatpush1.bf16.msra.mxu0 %v419_v11  ;;  %v449_v32 = vld [vmem:[#allocation3 + $0xe0] ss:$16 sps:$4 sm:$0xff]   ;;  %v450_v33 = vld [vmem:[#allocation3 + $0xe8] ss:$16 sps:$4 sm:$0xff]   ;;  %s356_s29 = sshll.u32 %s503_s2, 4  ;;  %s357_s29 = int_to_ptr.vmem [resolvable:$true] %s356_s29 }
  0x1f   :  { %281 = vmatpush1.bf16.msra.mxu1 %v420_v12  ;;  %241 = vmatprep.subr.bf16.mxu0 %v421_v13  ;;  %v42_v34 = vld [vmem:[%s554_s0] sm:$0xf]  ;;  %s473_s0 = scalar_lea.vmem %s357_s29, 512  ;;  %p478_p9 = scmp.lt.s32.totalorder %s357_s29, %s357_s29 }
  0x20   :  { %282 = vmatprep.subr.bf16.mxu1 %v423_v14  ;;  %p474_p8 = scmp.ne.s32.totalorder %s357_s29, %s473_s0  ;;  %p479_p10 = scmp.lt.s32.totalorder %s473_s0, %s473_s0 }
  0x22   :  { %242 = vmatpush1.bf16.msra.mxu0 %v425_v15  ;;  %p480_p11 = por %p479_p10, %p478_p9 }
  0x23   :  { %283 = vmatpush1.bf16.msra.mxu1 %v426_v16  ;;  %243 = vmatprep.subr.bf16.mxu0 %v427_v17 }
  0x24   :  { %284 = vmatprep.subr.bf16.mxu1 %v429_v18  ;;  %p481_p12 = pnand %p480_p11, %p474_p8 }
  0x26   :  { %244 = vmatpush1.bf16.msra.mxu0 %v431_v19 }
  0x27   :  { %285 = vmatpush1.bf16.msra.mxu1 %v432_v20  ;;  %245 = vmatprep.subr.bf16.mxu0 %v433_v21 }
  0x28   :  { %286 = vmatprep.subr.bf16.mxu1 %v435_v22 }
  0x2a   :  { %246 = vmatpush1.bf16.msra.mxu0 %v437_v23 }
  0x2b   :  { %287 = vmatpush1.bf16.msra.mxu1 %v438_v24  ;;  %247 = vmatprep.subr.bf16.mxu0 %v439_v25 }
  0x2c   :  { %288 = vmatprep.subr.bf16.mxu1 %v441_v26 }
  0x2e   :  { %248 = vmatpush1.bf16.msra.mxu0 %v443_v28 }
  0x2f   :  { %289 = vmatpush1.bf16.msra.mxu1 %v444_v29  ;;  %249 = vmatprep.subr.bf16.mxu0 %v445_v30 }
  0x30   :  { %290 = vmatprep.subr.bf16.mxu1 %v447_v31 }
  0x32   :  { %250 = vmatpush1.bf16.msra.mxu0 %v449_v32 }
  0x33   :  { %291 = vmatpush1.bf16.msra.mxu1 %v450_v33 }
  0x35   :  { %268 = vmatmul.mubr.bf16.vlgmr.msra.gmra.mrb[0].mxu0 %v42_v34 }
  0x36   :  { %309 = vmatmul.mubr.bf16.vlgmr.msra.gmra.mrb[0].mxu1 %v42_v34 }
  0x9c   :  { %v336_v35 = vpop.permute.xlu0 %335 }
 0x108   :  { %v269_v36 = vpop.f32.mrb[0].mxu0 }
 0x109   :  { %v310_v37 = vpop.f32.mrb[0].mxu1  ;;  %v338_v38 = vadd.f32 %v336_v35, %v269_v36  ;;  %v271_v40 = vpop.f32.mrb[1].mxu0 }
 0x10a   :  { %v340_v39 = vadd.f32 %v336_v35, %v310_v37  ;;  %v312_v41 = vpop.f32.mrb[1].mxu1  ;;  %v339_v42 = vadd.f32 %v336_v35, %v271_v40  ;;  %v273_v44 = vpop.f32.mrb[2].mxu0 }
 0x10b   :  { %v341_v43 = vadd.f32 %v336_v35, %v312_v41  ;;  %v314_v45 = vpop.f32.mrb[2].mxu1  ;;  %v342_v46 = vmax.f32 %v338_v38, 0.0  ;;  %v274_v48 = vpop.f32.mrb[3].mxu0 }
 0x10c   :  { %v344_v47 = vmax.f32 %v340_v39, 0.0  ;;  %v315_v49 = vpop.f32.mrb[3].mxu1  ;;  %v343_v50 = vmax.f32 %v339_v42, 0.0 }
 0x10d   :  { %v345_v51 = vmax.f32 %v341_v43, 0.0  ;;  %346 = vst [vmem:[#allocation6] sm:$0xff] %v342_v46 }
 0x10e   :  { %348 = vst [vmem:[#allocation6 + $0x10] sm:$0xff] %v344_v47  ;;  %347 = vst [vmem:[#allocation6 + $0x8] sm:$0xff] %v343_v50 }
 0x10f   :  { %349 = vst [vmem:[#allocation6 + $0x18] sm:$0xff] %v345_v51 }
 0x110   :  { %484 = shalt.err (!%p481_p12)
}
 0x111   :  { %s485_s5 = scalar_lea.hbm %s557_s3, 512 }
 0x112   :  { %p486_p13 = scmp.ne.s32.totalorder %s557_s3, %s485_s5  ;;  %p489_p0 = scmp.lt.u32.totalorder %s485_s5, %s557_s3 }
 0x114   :  { %p491_p1 = pnand %p489_p0, %p486_p13 }
 0x116   :  { %494 = shalt.err (!%p491_p1)
}
 0x117   :  { %359 = dma.vmem_to_hbm [thread:$0]  %s357_s29, 512, %s557_s3, [#allocation5]  }
 0x118   :  { %497 = dma.done.wait [#allocation5], 512  }
 0x119   :  { %498 = vsyncadd [#allocation5], 4294966784 }
 0x11a   :  { %363 = vsyncpa [#allocation4], 1 }
 0x11b   :  { %364 = vsyncpa [#allocation5], 1 }

</bundles_post_ra>
